<compile_context>
chip_gen: v5e
topology: v5e:2x2
jax: 0.10.0
libtpu: 0.0.40
codegen_flags: <defaults>
</compile_context>

<pallas_src>
import functools

import jax
import jax.numpy as jnp
from jax import lax
from jax.experimental import pallas as pl
from jax.experimental.pallas import tpu as pltpu


def _round_up(x, m):
    return ((x + m - 1) // m) * m


def _proto_dist_kernel(scale, num_way, xq_ref, protos2_ref, cnorm_ref,
                       negd_ref, yhat_ref):
    """One query tile: negative scaled distances + fused per-row argmax.

    xq_ref     : (TQ, D)      query embeddings (one tile of rows, input dtype)
    protos2_ref: (W_pad, D)   2 * prototypes, zero-padded, VMEM-resident
    cnorm_ref  : (1, W_pad)   squared prototype norms (f32), VMEM-resident
    negd_ref   : (TQ, W_pad)  output: -cdist(xq, protos) / temperature
    yhat_ref   : (TQ, 1)      output: argmin_class distance (int32)
    """
    xq = xq_ref[...]                                      # (TQ, D) input dtype

    # ||q||^2 per query row, accumulated in f32 (VPU + lane reduce, small).
    xq_f32 = xq.astype(jnp.float32)
    q_norm2 = jnp.sum(xq_f32 * xq_f32, axis=-1, keepdims=True)      # (TQ, 1)

    # q @ (2c)^T on the MXU; contract the feature (lane) axis of both operands
    # directly so no explicit transpose is materialized.  Operands stay in the
    # input dtype (single native MXU pass for bf16), accumulate in f32.
    gram2 = lax.dot_general(
        xq, protos2_ref[...],
        dimension_numbers=(((1,), (1,)), ((), ())),
        preferred_element_type=jnp.float32,
    )                                                     # (TQ, W_pad)

    d2 = q_norm2 + cnorm_ref[...] - gram2
    d2 = jnp.maximum(d2, 0.0)                             # guard cancellation
    negd = jnp.sqrt(d2) * scale                           # = -D / temperature
    negd_ref[...] = negd.astype(negd_ref.dtype)

    # Fused classification: argmax of -D == argmin of D, restricted to the
    # real classes (padded columns masked to -inf).  Tie-break = lowest index,
    # matching torch.argmin.
    tq, w_pad = negd.shape
    col = lax.broadcasted_iota(jnp.int32, (tq, w_pad), 1)
    masked = jnp.where(col < num_way, negd, -jnp.inf)
    best = jnp.max(masked, axis=-1, keepdims=True)
    yhat_ref[...] = jnp.min(
        jnp.where(masked == best, col, w_pad), axis=-1, keepdims=True
    ).astype(yhat_ref.dtype)


def proto_loss_forward(X, labels, *, num_way, num_shot, num_query, temperature,
                       tile_q=512):
    """JAX wrapper reproducing ProtoLoss.forward (BPA=None)."""
    del num_query  # implicit: all rows past the labeled ones are queries
    num_labeled = num_way * num_shot
    feat_dim = X.shape[-1]

    # --- prototypes: mean over shots, computed once (tiny XLA op) -----------
    X_s = X[:num_labeled].reshape(num_shot, num_way, feat_dim)
    protos = jnp.mean(X_s.astype(jnp.float32), axis=0)               # (W, D)

    # Pad the class axis to a lane-dense multiple of 128 so the big output
    # stores are unmasked full-lane vst's.  Fold the Gram-expansion factor 2
    # into the prototype operand; keep the norms from the unscaled prototypes.
    w_pad = _round_up(max(num_way, 1), 128)
    protos2_pad = jnp.zeros((w_pad, feat_dim), X.dtype).at[:num_way].set(
        (2.0 * protos).astype(X.dtype))
    protos_pad_f32 = jnp.zeros((w_pad, feat_dim), jnp.float32).at[:num_way].set(protos)
    c_norm2 = jnp.sum(protos_pad_f32 * protos_pad_f32, axis=-1)[None, :]  # (1, W_pad)

    # --- queries: NO padding copy; ragged last tile handled by the pipeline -
    X_q = X[num_labeled:]
    nq = X_q.shape[0]
    if nq == 0:  # guard the empty-grid edge case
        return jnp.zeros((0, num_way), jnp.float32), jnp.float32(jnp.nan)

    # Tile-size selection:
    #   * >= 2 grid steps when possible (v7x: 2 TensorCores via "parallel").
    #   * double-buffered query tile + output tile <= ~8 MiB so the kernel fits
    #     v5e's 16 MiB default scoped VMEM (v6e/v7x defaults are larger).
    in_isz = jnp.dtype(X.dtype).itemsize
    row_bytes = 2 * feat_dim * in_isz + 2 * w_pad * 4     # both double-buffered
    tq_cap = max(8, ((8 * 1024 * 1024) // row_bytes) // 8 * 8)
    tq = max(8, min(tile_q, tq_cap, _round_up(pl.cdiv(nq, 2), 8)))
    grid = (pl.cdiv(nq, tq),)
    scale = -1.0 / float(temperature)

    neg_dist_pad, y_hat_col = pl.pallas_call(
        functools.partial(_proto_dist_kernel, scale, num_way),
        out_shape=(
            jax.ShapeDtypeStruct((nq, w_pad), jnp.float32),
            jax.ShapeDtypeStruct((nq, 1), jnp.int32),
        ),
        grid=grid,
        in_specs=[
            pl.BlockSpec((tq, feat_dim), lambda i: (i, 0)),      # query tile
            pl.BlockSpec((w_pad, feat_dim), lambda i: (0, 0)),   # 2*protos, resident
            pl.BlockSpec((1, w_pad), lambda i: (0, 0)),          # ||c||^2, resident
        ],
        out_specs=(
            pl.BlockSpec((tq, w_pad), lambda i: (i, 0)),
            pl.BlockSpec((tq, 1), lambda i: (i, 0)),
        ),
        compiler_params=pltpu.CompilerParams(
            dimension_semantics=("parallel",)),
    )(X_q, protos2_pad, c_norm2)

    # Returned logits: exactly num_way columns (padded cols sliced off).
    neg_dist = neg_dist_pad[:, :num_way]

    # get_accuracy: y_hat already computed in-kernel (argmin over real classes).
    y_hat = y_hat_col[:, 0]
    acc = jnp.mean((labels.astype(jnp.int32) == y_hat).astype(jnp.float32))
    return neg_dist, acc


def _reference_forward(X, labels, *, num_way, num_shot, temperature):
    """Pure-JAX reference mirroring the torch code, for a sanity check."""
    num_labeled = num_way * num_shot
    X_s, X_q = X[:num_labeled], X[num_labeled:]
    X_c = jnp.mean(
        jnp.transpose(X_s.reshape(num_shot, num_way, -1), (1, 0, 2)), axis=1
    )
    diff = X_q[:, None, :] - X_c[None, :, :]
    D = jnp.sqrt(jnp.sum(diff * diff, axis=-1)) / temperature
    y_hat = jnp.argmin(D, axis=-1)
    acc = jnp.mean((labels == y_hat).astype(jnp.float32))
    return -D, acc


if __name__ == "__main__":
    # Small episode: 5-way, 2-shot, 3 queries per way, 32-dim embeddings.
    args = dict(train_way=5, val_way=5, num_shot=2, num_query=3, temperature=64.0)
    mode = "train"
    num_way = args["train_way"] if mode == "train" else args["val_way"]
    num_shot = args["num_shot"]
    num_query = args["num_query"]
    temperature = args["temperature"]
    feat_dim = 32

    num_labeled = num_way * num_shot
    num_queries = num_way * num_query
    total = num_labeled + num_queries

    key = jax.random.PRNGKey(0)
    k_x, _ = jax.random.split(key)
    X = jax.random.normal(k_x, (total, feat_dim), dtype=jnp.float32)
    # Query labels: episodes are shot-major, i.e. [0..way-1] repeated per query.
    labels = jnp.tile(jnp.arange(num_way, dtype=jnp.int32), num_query)

    neg_D, acc = proto_loss_forward(
        X, labels,
        num_way=num_way, num_shot=num_shot,
        num_query=num_query, temperature=temperature,
    )
    neg_D = jax.block_until_ready(neg_D)
    acc = jax.block_until_ready(acc)

    # Sanity-check against the pure-JAX reference (Gram-matrix expansion can
    # differ from the broadcasted-difference path at ~1e-5 level).
    ref_neg_D, ref_acc = _reference_forward(
        X, labels, num_way=num_way, num_shot=num_shot, temperature=temperature
    )
    assert neg_D.shape == (num_queries, num_way)
    assert jnp.allclose(neg_D, ref_neg_D, atol=1e-4, rtol=1e-4)
    assert jnp.allclose(acc, ref_acc)

    print("KERNEL_OK")
</pallas_src>

<mosaic_0001>
module attributes {stable_mosaic.version = 11 : i64} {
  func.func @_proto_dist_kernel(%arg0: i32, %arg1: memref<8x32xf32, #tpu.memory_space<vmem>>, %arg2: memref<128x32xf32, #tpu.memory_space<vmem>>, %arg3: memref<1x128xf32, #tpu.memory_space<vmem>>, %arg4: memref<8x128xf32, #tpu.memory_space<vmem>>, %arg5: memref<8x1xi32, #tpu.memory_space<vmem>>) attributes {dimension_semantics = [#tpu.dimension_semantics<parallel>], iteration_bounds = array<i64: 2>, scalar_prefetch = 0 : i64, scratch_operands = 0 : i64, tpu.core_type = #tpu.core_type<tc>, window_params = [{transform_indices = @transform_0, window_bounds = array<i64: 8, 32>}, {pipeline_mode = #tpu.pipeline_mode<synchronous>, transform_indices = @transform_1, window_bounds = array<i64: 128, 32>}, {pipeline_mode = #tpu.pipeline_mode<synchronous>, transform_indices = @transform_2, window_bounds = array<i64: 1, 128>}, {transform_indices = @transform_3, window_bounds = array<i64: 8, 128>}, {transform_indices = @transform_4, window_bounds = array<i64: 8, 1>}]} {
    %c0 = arith.constant 0 : index
    %c0_0 = arith.constant 0 : index
    %0 = vector.load %arg1[%c0, %c0_0] : memref<8x32xf32, #tpu.memory_space<vmem>>, vector<8x32xf32>
    %1 = arith.mulf %0, %0 : vector<8x32xf32>
    %cst = arith.constant dense<0.000000e+00> : vector<8xf32>
    %2 = vector.multi_reduction <add>, %1, %cst [1] : vector<8x32xf32> to vector<8xf32>
    %3 = vector.shape_cast %2 : vector<8xf32> to vector<8x1xf32>
    %c0_1 = arith.constant 0 : index
    %c0_2 = arith.constant 0 : index
    %4 = vector.load %arg2[%c0_1, %c0_2] : memref<128x32xf32, #tpu.memory_space<vmem>>, vector<128x32xf32>
    %cst_3 = arith.constant dense<0.000000e+00> : vector<8x128xf32>
    %5 = tpu.matmul %0, %4, %cst_3 {dimension_numbers = #tpu.dot_dimension_numbers<[1], [1], [0], [0], [0, 0, 1, 0], [], []>} : vector<8x32xf32>, vector<128x32xf32>, vector<8x128xf32> -> vector<8x128xf32>
    %c0_4 = arith.constant 0 : index
    %c0_5 = arith.constant 0 : index
    %6 = vector.load %arg3[%c0_4, %c0_5] : memref<1x128xf32, #tpu.memory_space<vmem>>, vector<1x128xf32>
    %7 = vector.broadcast %3 : vector<8x1xf32> to vector<8x128xf32>
    %8 = vector.broadcast %6 : vector<1x128xf32> to vector<8x128xf32>
    %9 = arith.addf %7, %8 : vector<8x128xf32>
    %10 = arith.subf %9, %5 : vector<8x128xf32>
    %cst_6 = arith.constant 0.000000e+00 : f32
    %11 = vector.broadcast %cst_6 : f32 to vector<8x128xf32>
    %12 = arith.maximumf %10, %11 : vector<8x128xf32>
    %13 = math.sqrt %12 : vector<8x128xf32>
    %cst_7 = arith.constant -1.562500e-02 : f32
    %14 = vector.broadcast %cst_7 : f32 to vector<8x128xf32>
    %15 = arith.mulf %13, %14 : vector<8x128xf32>
    %c0_8 = arith.constant 0 : index
    %c0_9 = arith.constant 0 : index
    %16 = vector.load %arg4[%c0_8, %c0_9] : memref<8x128xf32, #tpu.memory_space<vmem>>, vector<8x128xf32>
    tpu.vector_store %arg4[%c0_8, %c0_9], %15 {strides = array<i32>} : memref<8x128xf32, #tpu.memory_space<vmem>>, vector<8x128xf32>,
    %17 = tpu.iota {dimensions = array<i32: 1>} : vector<8x128xi32>
    %c5_i32 = arith.constant 5 : i32
    %18 = vector.broadcast %c5_i32 : i32 to vector<8x128xi32>
    %19 = arith.cmpi slt, %17, %18 : vector<8x128xi32>
    %cst_10 = arith.constant 0xFF800000 : f32
    %20 = vector.broadcast %cst_10 : f32 to vector<8x128xf32>
    %21 = arith.select %19, %15, %20 : vector<8x128xi1>, vector<8x128xf32>
    %cst_11 = arith.constant dense<0xFF800000> : vector<8xf32>
    %22 = vector.multi_reduction <maximumf>, %21, %cst_11 [1] : vector<8x128xf32> to vector<8xf32>
    %23 = vector.shape_cast %22 : vector<8xf32> to vector<8x1xf32>
    %24 = vector.broadcast %23 : vector<8x1xf32> to vector<8x128xf32>
    %25 = arith.cmpf oeq, %21, %24 : vector<8x128xf32>
    %c128_i32 = arith.constant 128 : i32
    %26 = vector.broadcast %c128_i32 : i32 to vector<8x128xi32>
    %27 = arith.select %25, %17, %26 : vector<8x128xi1>, vector<8x128xi32>
    %cst_12 = arith.constant dense<2147483647> : vector<8xi32>
    %28 = vector.multi_reduction <minsi>, %27, %cst_12 [1] : vector<8x128xi32> to vector<8xi32>
    %29 = vector.shape_cast %28 : vector<8xi32> to vector<8x1xi32>
    %c0_13 = arith.constant 0 : index
    %c0_14 = arith.constant 0 : index
    %30 = vector.load %arg5[%c0_13, %c0_14] : memref<8x1xi32, #tpu.memory_space<vmem>>, vector<8x1xi32>
    tpu.vector_store %arg5[%c0_13, %c0_14], %29 {strides = array<i32>} : memref<8x1xi32, #tpu.memory_space<vmem>>, vector<8x1xi32>,
    return
  }
  func.func @transform_0(%arg0: i32) -> (i32, i32) {
    %c0_i32 = arith.constant 0 : i32
    %c0_i32_0 = arith.constant 0 : i32
    return %arg0, %c0_i32 : i32, i32
  }
  func.func @transform_1(%arg0: i32) -> (i32, i32) {
    %c0_i32 = arith.constant 0 : i32
    %c0_i32_0 = arith.constant 0 : i32
    %c0_i32_1 = arith.constant 0 : i32
    return %c0_i32, %c0_i32_0 : i32, i32
  }
  func.func @transform_2(%arg0: i32) -> (i32, i32) {
    %c0_i32 = arith.constant 0 : i32
    %c0_i32_0 = arith.constant 0 : i32
    %c0_i32_1 = arith.constant 0 : i32
    return %c0_i32, %c0_i32_0 : i32, i32
  }
  func.func @transform_3(%arg0: i32) -> (i32, i32) {
    %c0_i32 = arith.constant 0 : i32
    %c0_i32_0 = arith.constant 0 : i32
    return %arg0, %c0_i32 : i32, i32
  }
  func.func @transform_4(%arg0: i32) -> (i32, i32) {
    %c0_i32 = arith.constant 0 : i32
    %c0_i32_0 = arith.constant 0 : i32
    return %arg0, %c0_i32 : i32, i32
  }
}

</mosaic_0001>

<bundles_post_ra>
// kernel: tpu_custom_call.1
= control target key start
LH: loop header
LB: loop body
LE: loop exit
PB: predicated region body
PF: predicated region fallthrough
CT: control target
= control target key end

     0   :  { %10 = vsyncpa [#allocation3], 0  ;;  %s771_s0 = inlined_call_operand.vmem [shape: f32[15,32], index: 0, kind: input, shape index: {}]   ;;  %s772_s1 = inlined_call_operand.vmem [shape: f32[128,32], index: 1, kind: input, shape index: {}]   ;;  %s773_s2 = inlined_call_operand.vmem [shape: f32[1,128], index: 2, kind: input, shape index: {}]   ;;  %s774_s3 = inlined_call_operand.hbm [shape: f32[15,128], index: 3, kind: output, shape index: {0}]   ;;  %s775_s4 = inlined_call_operand.vmem [shape: s32[15,1], index: 4, kind: output, shape index: {1}]  }
   0x1   :  { %12 = vsyncpa [#allocation3 + $0x1], 0  ;;  %s607_s15 = smov 0   ;;  %s609_s16 = smov 0  }
   0x2   :  { %s611_s17 = smov 0   ;;  %s613_s18 = smov 0  }
   0x3 LB: > { %s628_s19 = sadd.s32 4294967295, %s580_s18   ;;  %s448_s20 = sadd.s32 4294967294, %s580_s18   ;;  %s580_s18 = sphi %s613_s18, %s781_s18   ;;  %s576_s17 = sphi %s611_s17, %s780_s17   ;;  %s572_s16 = sphi %s609_s16, %s779_s16   ;;  %s568_s15 = sphi %s607_s15, %s778_s15  }
   0x4   : > { %s632_s21 = sadd.s32 1, %s580_s18   ;;  %s93_s22 = sadd.s32 1, %s576_s17 }
   0x5   : > { %s90_s23 = ssub.s32 %s580_s18, %s632_s21  ;;  %p103_p0 = scmp.ne.s32.totalorder %s576_s17, %s572_s16 }
   0x6   : > { %p91_p1 = scmp.eq.s32.totalorder %s90_s23, 0  ;;  %p104_p2 = scmp.eq.s32.totalorder %s628_s19, 1 }
   0x7   : > { %p109_p3 = scmp.ne.s32.totalorder %s572_s16, %s568_s15  ;;  %p110_p4 = scmp.eq.s32.totalorder %s448_s20, 1 }
   0x8   : > { %s643_s24 = scalar_select %p91_p1, %s576_s17, %s93_s22  }
   0x9   : > { %p645_p5 = por %p104_p2, %p103_p0  ;;  %p649_p6 = por %p110_p4, %p109_p3 }
   0xa   : > { %p451_p7 = scmp.ge.s32.totalorder %s580_s18, 1  ;;  %p167_p8 = scmp.lt.s32.totalorder %s580_s18, 3 }
   0xc   : > { %p168_p9 = pnand %p451_p7, %p167_p8 }
   0xd   : > { %p196_p10 = scmp.lt.s32.totalorder (!%p168_p9), %s628_s19, 1  ;;  %s187_s8 = sand.u32 (!%p168_p9), 1, %s572_s16  }
   0xe   : > { %171 = sbr.rel (%p168_p9) target bundleno = 598 (0x256), region = 32  ;;  %s452_s9 = sshll.u32 (!%p168_p9), %s187_s8, 3 }
   0xf   : > { %s189_s10 = scalar_lea.vmem (!%p168_p9), [#allocation2], %s452_s9  ;;  %s473_s11 = sshll.u32 (!%p168_p9), %s628_s19, 3 }
  0x10   : > { %s357_s20 = scalar_lea.hbm (!%p168_p9), %s774_s3, %s473_s11  ;;  %s359_s23 = sshll.u32 (!%p168_p9), %s189_s10, 4  ;;  %s360_s23 = int_to_ptr.vmem [resolvable:$true] %s359_s23 }
  0x11   : > { %s361_s27 = sshll.u32 (!%p168_p9), %s357_s20, 4  ;;  %s343_s28 = scalar_lea.sflag (!%p168_p9), [#allocation3], %s187_s8  ;;  %s362_s27 = int_to_ptr.hbm [resolvable:$true] %s361_s27 }
  0x12   : > { %s532_s29 = sshra.s32 (!%p168_p9), %s362_s27, 4  ;;  %s533_s29 = int_to_ptr.hbm [resolvable:$true] %s532_s29 }
  0x13   : > { %vm206_vm0 = vcmask 261120   ;;  %v225_v0 = vld [vmem:[%s772_s1 + $0x78] sm:$0xff]  ;;  %v224_v1 = vld [vmem:[%s772_s1 + $0x70] sm:$0xff]  ;;  %v223_v2 = vld [vmem:[%s772_s1 + $0x68] sm:$0xff]  ;;  %s681_s13 = scalar_select %p196_p10, %s628_s19, 1  ;;  %v318_v29 = vlaneseq }
  0x14   : > { %455 = vmatpush.xpose.msk.msra.mxu0 %vm206_vm0, %v225_v0  ;;  %v222_v3 = vld [vmem:[%s772_s1 + $0x60] sm:$0xff]  ;;  %v221_v4 = vld [vmem:[%s772_s1 + $0x58] sm:$0xff]  ;;  %v220_v5 = vld [vmem:[%s772_s1 + $0x50] sm:$0xff]  ;;  %s538_s19 = scalar_lea.hbm %s774_s3, 16  ;;  %p539_p0 = scmp.lt.s32.totalorder %s533_s29, %s774_s3 }
  0x15   : > { %v219_v6 = vld [vmem:[%s772_s1 + $0x48] sm:$0xff]  ;;  %s453_s22 = sshll.u32 %s681_s13, 3  ;;  %v218_v7 = vld [vmem:[%s772_s1 + $0x40] sm:$0xff]  ;;  %v217_v8 = vld [vmem:[%s772_s1 + $0x38] sm:$0xff]  ;;  %v319_v32 = vand.u32 127, %v318_v29 }
  0x16   : > { %s199_s30 = scalar_lea.vmem %s771_s0, %s453_s22  ;;  %v216_v11 = vld [vmem:[%s772_s1 + $0x30] sm:$0xff]  ;;  %v215_v13 = vld [vmem:[%s772_s1 + $0x28] sm:$0xff]  ;;  %v214_v14 = vld [vmem:[%s772_s1 + $0x20] sm:$0xff] }
  0x17   : > { %v204_v9 = vld [vmem:[%s199_s30] sm:$0xff]  ;;  %v213_v15 = vld [vmem:[%s772_s1 + $0x18] sm:$0xff]  ;;  %v212_v16 = vld [vmem:[%s772_s1 + $0x10] sm:$0xff]  ;;  %vm320_vm3 = vcmp.lt.s32.totalorder %v319_v32, 5  ;;  %s534_s30 = scalar_lea.hbm %s533_s29, 8 }
  0x18   : > { %456 = vmatpush.xpose.msk.msra.mxu0 %vm206_vm0, %v224_v1  ;;  %v205_v10 = vmul.f32 %v204_v9, %v204_v9  ;;  %v211_v17 = vld [vmem:[%s772_s1 + $0x8] sm:$0xff]  ;;  %v210_v18 = vld [vmem:[%s772_s1] sm:$0xff]  ;;  %p535_p11 = scmp.ne.s32.totalorder %s533_s29, %s534_s30  ;;  %p540_p1 = scmp.lt.s32.totalorder %s538_s19, %s534_s30 }
  0x19   : > { %v515_v19 = vld [vmem:[%s773_s2] ss:$0 sm:$0xff] }
  0x1a   : > { %v207_v12 = vsel %vm206_vm0, %v205_v10, 0.0  ;;  %p536_p12 = pnand %p535_p11, %p645_p5  ;;  %p541_p2 = por %p540_p1, %p539_p0 }
  0x1b   : > { %208 = vadd.xlane.f32.xlu0 %v207_v12 }
  0x1c   : > { %457 = vmatpush.xpose.msk.msra.mxu0 %vm206_vm0, %v223_v2  ;;  %p537_p13 = pneg %p536_p12 }
  0x1e   : > { %p542_p3 = pnand %p541_p2, %p537_p13 }
  0x20   : > { %458 = vmatpush.xpose.msk.msra.mxu0 %vm206_vm0, %v222_v3 }
  0x24   : > { %459 = vmatpush.xpose.msk.msra.mxu0 %vm206_vm0, %v221_v4 }
  0x28   : > { %460 = vmatpush.xpose.msk.msra.mxu0 %vm206_vm0, %v220_v5 }
  0x2c   : > { %461 = vmatpush.xpose.msk.msra.mxu0 %vm206_vm0, %v219_v6 }
  0x30   : > { %462 = vmatpush.xpose.msk.msra.mxu0 %vm206_vm0, %v218_v7 }
  0x34   : > { %463 = vmatpush.xpose.msk.msra.mxu0 %vm206_vm0, %v217_v8 }
  0x38   : > { %464 = vmatpush.xpose.msk.msra.mxu0 %vm206_vm0, %v216_v11 }
  0x3c   : > { %465 = vmatpush.xpose.msk.msra.mxu0 %vm206_vm0, %v215_v13 }
  0x40   : > { %466 = vmatpush.xpose.msk.msra.mxu0 %vm206_vm0, %v214_v14 }
  0x44   : > { %467 = vmatpush.xpose.msk.msra.mxu0 %vm206_vm0, %v213_v15 }
  0x48   : > { %468 = vmatpush.xpose.msk.msra.mxu0 %vm206_vm0, %v212_v16 }
  0x4c   : > { %469 = vmatpush.xpose.msk.msra.mxu0 %vm206_vm0, %v211_v17 }
  0x50   : > { %470 = vmatpush.xpose.msk.msra.mxu0 %vm206_vm0, %v210_v18 }
  0x53   : > { %471 = vmatmul.msk.f32.vlgmr.msra.gmra.mxu0 %vm206_vm0, %v204_v9 }
  0x8e   : > { %v209_v20 = vpop.xlane.xlu0 %208 }
  0x8f   : > { %v301_v21 = vadd.f32 %v515_v19, %v209_v20 }
  0xd0   : > { %v294_v22 = vpop.f32.mrf.mxu0 }
  0xd1   : > { %v302_v23 = vsub.f32 %v301_v21, %v294_v22 }
  0xd3   : > { %v303_v24 = vmax.f32 %v302_v23, 0.0 }
  0xd5   : > { %516 = vrsqrt.f32 %v303_v24  ;;  %vm311_vm1 = vcmp.eq.f32.partialorder %v303_v24, inf  ;;  %v314_v34 = vand.u32 2147483648, %v303_v24  ;;  %vm313_vm2 = vcmp.eq.f32.partialorder %v303_v24, 0.0 }
  0xdb   : > { %v517_v25 = vpop.eup %516 }
  0xdc   : > { %v305_v26 = vmul.f32 %v517_v25, %v303_v24 }
  0xde   : > { %v306_v27 = vmul.f32 %v517_v25, %v305_v26 }
  0xe0   : > { %v307_v28 = vmul.f32 0.5, %v306_v27 }
  0xe2   : > { %v308_v30 = vsub.f32 1.5, %v307_v28 }
  0xe4   : > { %v309_v31 = vmul.f32 %v517_v25, %v308_v30 }
  0xe6   : > { %v310_v33 = vmul.f32 %v309_v31, %v303_v24 }
  0xe8   : > { %v312_v35 = vsel %vm311_vm1, %v303_v24, %v310_v33 }
  0xe9   : > { %v315_v36 = vsel %vm313_vm2, %v314_v34, %v312_v35 }
  0xea   : > { %v316_v37 = vmul.f32 -0.015625, %v315_v36 }
  0xec   : > { %v321_v38 = vsel %vm320_vm3, %v316_v37, -inf  ;;  %317 = vst [vmem:[%s189_s10] sm:$0xff] %v316_v37 }
  0xed   : > { %322 = vmax.xlane.f32.xlu0 %v321_v38 }
 0x160   : > { %v323_v39 = vpop.xlane.xlu0 %322 }
 0x161   : > { %vm324_vm4 = vcmp.eq.f32.partialorder %v321_v38, %v323_v39 }
 0x162   : > { %v325_v40 = vsel %vm324_vm4, %v319_v32, 128 }
 0x163   : > { %v327_v41 = vshra.s32 %v325_v40, 16  ;;  %v326_v43 = vand.u32 65535, %v325_v40 }
 0x165   : > { %v329_v42 = vcvt.s32.f32 %v327_v41 }
 0x167   : > { %330 = vmin.xlane.f32.xlu1 %v329_v42 }
 0x168   : > { %545 = shalt.err (!%p542_p3)
}
 0x169   : > { %476 = dma.vmem_to_hbm [thread:$0]  (%p645_p5), %s360_s23, 128, %s362_s27, %s343_s28   ;;  %v328_v45 = vcvt.s32.f32 %v326_v43  ;;  %vm340_vm6 = vcmask 7168  }
 0x16a   : > { %s203_s11 = scalar_lea.vmem %s775_s4, %s453_s22 }
 0x1da   : > { %v331_v44 = vpop.xlane.xlu1 %330 }
 0x1db   : > { %vm332_vm5 = vcmp.eq.f32.partialorder %v329_v42, %v331_v44  ;;  %v337_v47 = vcvt.f32.s32 %v331_v44 }
 0x1dc   : > { %v333_v46 = vsel %vm332_vm5, %v328_v45, inf }
 0x1dd   : > { %334 = vmin.xlane.f32.xlu1 %v333_v46  ;;  %v338_v49 = vshll.u32 %v337_v47, 16 }
 0x250   : > { %v335_v48 = vpop.xlane.xlu1 %334 }
 0x251   : > { %v336_v50 = vcvt.f32.s32 %v335_v48 }
 0x253   : > { %v339_v51 = vadd.s32 %v338_v49, %v336_v50 }
 0x255   : > { %341 = vst.msk [vmem:[%s203_s11] sm:$0xff] %vm340_vm6, %v339_v51 }
 0x256 PF: > { %p482_p4 = scmp.ge.s32.totalorder %s580_s18, 2  ;;  %s376_s25 = sand.u32 1, %s568_s15  }
 0x257   : > { %s377_s12 = scalar_lea.sflag [#allocation3], %s376_s25 }
 0x258   : > { %p479_p5 = pnand %p482_p4, %p649_p6 }
 0x25a   : > { %p480_p7 = pneg %p479_p5 }
 0x25c   : > { %563 = dma.done.wait (%p480_p7), %s377_s12, 128  }
 0x25d   : > { %565 = vsyncadd (%p480_p7), %s377_s12, 4294967168  ;;  %p15_p8 = scmp.ge.s32.totalorder %s632_s21, 4   ;;  %s778_s15 = smov %s572_s16 }
 0x25e   : > { %s779_s16 = smov %s576_s17  ;;  %s780_s17 = smov %s643_s24 }
 0x25f   : > { %s781_s18 = smov %s632_s21  ;;  %17 = sbr.rel (!%p15_p8) target bundleno = 3 (0x3), region = 79 }
 0x264   :  { %390 = vsyncpa [#allocation3], 1 }
 0x265   :  { %392 = vsyncpa [#allocation3 + $0x1], 1 }

</bundles_post_ra>
